<compile_context>
chip_gen: v7x
topology: tpu7x:2x2x1
jax: 0.10.0
libtpu: 0.0.40
codegen_flags: <defaults>
</compile_context>

<pallas_src>
import functools

import jax
import jax.numpy as jnp
from jax import lax
from jax.experimental import pallas as pl
from jax.experimental.pallas import tpu as pltpu


# --------------------------------------------------------------------------
# Entity-side kernel: gather + attention + scatter_softmax + scatter_mean
# --------------------------------------------------------------------------
def _entity_agg_kernel(n_edge, edge_tile,
                       head_sm, tail_sm, etype_sm,          # SMEM (scalar prefetch)
                       entity_ref, rel_ref, headlane_ref,   # VMEM inputs
                       ent_agg_ref,                         # output (acts as acc)
                       gh_ref, gt_ref, gr_ref,              # gather scratch (TE,D)
                       m_ref, s_ref, cnt_ref):              # per-node accumulators
    tile = pl.program_id(0)
    n_ent = entity_ref.shape[0]
    dim = entity_ref.shape[1]

    # ---- init accumulators on the first edge tile --------------------------
    @pl.when(tile == 0)
    def _():
        m_ref[...] = jnp.zeros_like(m_ref)      # att >= 0, so 0 is a safe floor
        s_ref[...] = jnp.zeros_like(s_ref)
        cnt_ref[...] = jnp.zeros_like(cnt_ref)
        ent_agg_ref[...] = jnp.zeros_like(ent_agg_ref)

    # ---- gather head/tail/relation rows for this tile (SMEM indices) -------
    e0 = tile * edge_tile

    def gather_body(i, carry):
        e = e0 + i
        gh_ref[pl.ds(i, 1), :] = entity_ref[pl.ds(head_sm[e], 1), :]
        gt_ref[pl.ds(i, 1), :] = entity_ref[pl.ds(tail_sm[e], 1), :]
        gr_ref[pl.ds(i, 1), :] = rel_ref[pl.ds(etype_sm[e], 1), :]
        return carry

    lax.fori_loop(0, edge_tile, gather_body, 0)

    gh = gh_ref[...]                                   # entity_emb[head]   (TE,D)
    gt = gt_ref[...]                                   # entity_emb[tail]   (TE,D)
    gr = gr_ref[...]                                   # relation_emb[type] (TE,D)

    tr = gt * gr                                       # neigh_relation_emb (TE,D)
    hr = gh * gr                                       # (TE,D)

    # att = (||h*r||_2 * ||t*r||_2)^2 == sum((h*r)^2) * sum((t*r)^2)
    contract_last = (((1,), (1,)), ((), ()))
    ones_row = jnp.ones((1, dim), jnp.float32)
    a_t = lax.dot_general(ones_row, tr * tr, contract_last,
                          preferred_element_type=jnp.float32)        # (1,TE)
    a_h = lax.dot_general(ones_row, hr * hr, contract_last,
                          preferred_element_type=jnp.float32)        # (1,TE)
    att = a_t * a_h                                                  # (1,TE)

    # mask padded edges of the (possibly partial) last tile
    lane = lax.broadcasted_iota(jnp.int32, (1, edge_tile), 1)
    valid = (e0 + lane) < n_edge                                     # (1,TE) bool
    att = jnp.where(valid, att, 0.0)

    # transposed one-hot scatter matrix: HT[n, e] = (head[e] == n) & valid[e]
    head_lane = headlane_ref[pl.ds(tile, 1), :]                      # (1,TE) int32
    node = lax.broadcasted_iota(jnp.int32, (n_ent, edge_tile), 0)
    htb = (head_lane == node) & valid                                # (N,TE) bool
    htf = htb.astype(jnp.float32)

    # ---- online per-node scatter-softmax accumulation ----------------------
    m_old = m_ref[...]                                               # (N,1)
    tile_max = jnp.max(jnp.where(htb, att, 0.0), axis=1, keepdims=True)
    m_new = jnp.maximum(m_old, tile_max)
    rescale = jnp.exp(m_old - m_new)                                 # (N,1) <= 1

    # per-edge group max: m_new[head[e]]
    edge_m = lax.dot_general(m_new, htf, (((0,), (0,)), ((), ())),
                             preferred_element_type=jnp.float32)     # (1,TE)
    p = jnp.exp(att - edge_m)                                        # (1,TE) <= 1

    s_tile = lax.dot_general(htf, p, contract_last,
                             preferred_element_type=jnp.float32)     # (N,1)
    acc_tile = jnp.dot(htf * p, tr,
                       preferred_element_type=jnp.float32)           # (N,D)
    cnt_tile = jnp.sum(htf, axis=1, keepdims=True)                   # (N,1)

    m_ref[...] = m_new
    s_ref[...] = s_ref[...] * rescale + s_tile
    cnt_ref[...] = cnt_ref[...] + cnt_tile
    ent_agg_ref[...] = ent_agg_ref[...] * rescale + acc_tile

    # ---- finalize: scatter_mean of softmax-weighted neighbours -------------
    @pl.when(tile == pl.num_programs(0) - 1)
    def _():
        cnt = cnt_ref[...]
        denom = jnp.maximum(s_ref[...] * cnt, 1e-30)
        ent_agg_ref[...] = jnp.where(cnt > 0, ent_agg_ref[...] / denom, 0.0)


# --------------------------------------------------------------------------
# User-side kernel: user_agg = inter@entity ; += softmax(user@rel^T)@rel * it
# --------------------------------------------------------------------------
def _user_agg_kernel(user_ref, rel_ref, inter_ref, entity_ref, out_ref):
    user_agg = jnp.dot(inter_ref[...], entity_ref[...],
                       preferred_element_type=jnp.float32)           # (TU,D)
    rel = rel_ref[...]
    score = lax.dot_general(user_ref[...], rel, (((1,), (1,)), ((), ())),
                            preferred_element_type=jnp.float32)      # (TU,R)
    score = score - jnp.max(score, axis=-1, keepdims=True)
    score = jnp.exp(score)
    score = score / jnp.sum(score, axis=-1, keepdims=True)
    out_ref[...] = user_agg + jnp.dot(score, rel,
                                      preferred_element_type=jnp.float32) * user_agg


# --------------------------------------------------------------------------
# Wrapper
# --------------------------------------------------------------------------
def aggregator(entity_emb, user_emb, relation_emb, edge_index, edge_type,
               inter_dense, *, edge_tile=32, user_tile=16):
    entity_emb = entity_emb.astype(jnp.float32)
    user_emb = user_emb.astype(jnp.float32)
    relation_emb = relation_emb.astype(jnp.float32)
    inter_dense = inter_dense.astype(jnp.float32)

    n_ent, dim = entity_emb.shape
    n_user = user_emb.shape[0]
    n_rel = relation_emb.shape[0]
    n_edge = edge_index.shape[1]

    # ---- edge indices: pad to a multiple of edge_tile, keep them 1-D (SMEM)
    n_tiles = pl.cdiv(n_edge, edge_tile)
    pad = n_tiles * edge_tile - n_edge
    head = jnp.pad(edge_index[0].astype(jnp.int32), (0, pad))
    tail = jnp.pad(edge_index[1].astype(jnp.int32), (0, pad))
    etype = jnp.pad(edge_type.astype(jnp.int32), (0, pad))
    head_lanes = head.reshape(n_tiles, edge_tile)   # lane-dense copy for one-hot

    ent_kernel = functools.partial(_entity_agg_kernel, n_edge, edge_tile)

    ent_agg = pl.pallas_call(
        ent_kernel,
        out_shape=jax.ShapeDtypeStruct((n_ent, dim), jnp.float32),
        grid_spec=pltpu.PrefetchScalarGridSpec(
            num_scalar_prefetch=3,
            grid=(n_tiles,),
            in_specs=[
                pl.BlockSpec((n_ent, dim), lambda t, h, tl, et: (0, 0)),
                pl.BlockSpec((n_rel, dim), lambda t, h, tl, et: (0, 0)),
                pl.BlockSpec((n_tiles, edge_tile), lambda t, h, tl, et: (0, 0)),
            ],
            out_specs=pl.BlockSpec((n_ent, dim), lambda t, h, tl, et: (0, 0)),
            scratch_shapes=[
                pltpu.VMEM((edge_tile, dim), jnp.float32),   # gathered head rows
                pltpu.VMEM((edge_tile, dim), jnp.float32),   # gathered tail rows
                pltpu.VMEM((edge_tile, dim), jnp.float32),   # gathered rel rows
                pltpu.VMEM((n_ent, 1), jnp.float32),         # running max  m
                pltpu.VMEM((n_ent, 1), jnp.float32),         # running sum  s
                pltpu.VMEM((n_ent, 1), jnp.float32),         # edge count   cnt
            ]),
        compiler_params=pltpu.CompilerParams(
            dimension_semantics=("arbitrary",),
            vmem_limit_bytes=32 * 1024 * 1024),
    )(head, tail, etype, entity_emb, relation_emb, head_lanes)

    # ---- user side: independent work, own grid (parallel over user tiles) --
    if n_user % user_tile:
        user_tile = n_user
    n_utiles = n_user // user_tile

    user_agg = pl.pallas_call(
        _user_agg_kernel,
        out_shape=jax.ShapeDtypeStruct((n_user, dim), jnp.float32),
        grid=(n_utiles,),
        in_specs=[
            pl.BlockSpec((user_tile, dim), lambda u: (u, 0)),
            pl.BlockSpec((n_rel, dim), lambda u: (0, 0)),
            pl.BlockSpec((user_tile, n_ent), lambda u: (u, 0)),
            pl.BlockSpec((n_ent, dim), lambda u: (0, 0)),
        ],
        out_specs=pl.BlockSpec((user_tile, dim), lambda u: (u, 0)),
        compiler_params=pltpu.CompilerParams(
            dimension_semantics=("parallel",),
            vmem_limit_bytes=32 * 1024 * 1024),
    )(user_emb, relation_emb, inter_dense, entity_emb)

    return ent_agg, user_agg


# --------------------------------------------------------------------------
# Pure-JAX reference (mirrors the PyTorch module)
# --------------------------------------------------------------------------
def reference(entity_emb, user_emb, relation_emb, edge_index, edge_type, inter_dense):
    head, tail = edge_index[0], edge_index[1]
    n_ent = entity_emb.shape[0]
    edge_rel = relation_emb[edge_type]
    neigh = entity_emb[tail] * edge_rel
    t2 = jnp.sum((entity_emb[tail] * edge_rel) ** 2, axis=1)
    h2 = jnp.sum((entity_emb[head] * edge_rel) ** 2, axis=1)
    att = h2 * t2                                   # == (||h*r|| * ||t*r||)^2
    grp_max = jax.ops.segment_max(att, head, num_segments=n_ent)
    exp_att = jnp.exp(att - grp_max[head])
    grp_sum = jax.ops.segment_sum(exp_att, head, num_segments=n_ent)
    w = exp_att / grp_sum[head]
    neigh = w[:, None] * neigh
    ent_sum = jax.ops.segment_sum(neigh, head, num_segments=n_ent)
    cnt = jax.ops.segment_sum(jnp.ones_like(head, jnp.float32), head,
                              num_segments=n_ent)
    ent_agg = ent_sum / jnp.maximum(cnt, 1.0)[:, None]
    user_agg = inter_dense @ entity_emb
    score = jax.nn.softmax(user_emb @ relation_emb.T, axis=-1)
    user_agg = user_agg + (score @ relation_emb) * user_agg
    return ent_agg, user_agg


if __name__ == "__main__":
    key = jax.random.PRNGKey(0)
    k1, k2, k3, k4, k5, k6, k7 = jax.random.split(key, 7)

    N_ENT, N_USER, N_REL, N_EDGE, DIM = 64, 32, 8, 100, 32
    SCALE = 0.5

    entity_emb = SCALE * jax.random.normal(k1, (N_ENT, DIM), jnp.float32)
    user_emb = SCALE * jax.random.normal(k2, (N_USER, DIM), jnp.float32)
    relation_emb = SCALE * jax.random.normal(k3, (N_REL, DIM), jnp.float32)
    head = jax.random.randint(k4, (N_EDGE,), 0, N_ENT, jnp.int32)
    tail = jax.random.randint(k5, (N_EDGE,), 0, N_ENT, jnp.int32)
    edge_index = jnp.stack([head, tail], axis=0)                   # [2, E]
    edge_type = jax.random.randint(k6, (N_EDGE,), 0, N_REL, jnp.int32)
    # densified sparse user-item interaction matrix [U, N_ENT]
    inter_dense = (jax.random.uniform(k7, (N_USER, N_ENT)) < 0.2).astype(jnp.float32)

    ent_agg, user_agg = aggregator(entity_emb, user_emb, relation_emb,
                                   edge_index, edge_type, inter_dense,
                                   edge_tile=32, user_tile=16)
    jax.block_until_ready((ent_agg, user_agg))

    ref_ent, ref_user = reference(entity_emb, user_emb, relation_emb,
                                  edge_index, edge_type, inter_dense)
    assert jnp.allclose(ent_agg, ref_ent, atol=2e-3, rtol=2e-3), \
        float(jnp.max(jnp.abs(ent_agg - ref_ent)))
    assert jnp.allclose(user_agg, ref_user, atol=2e-3, rtol=2e-3), \
        float(jnp.max(jnp.abs(user_agg - ref_user)))

    print("KERNEL_OK")
</pallas_src>

<mosaic_0001>
module attributes {stable_mosaic.version = 11 : i64} {
  func.func @_entity_agg_kernel(%arg0: i32, %arg1: memref<128xi32, #tpu.memory_space<smem>>, %arg2: memref<128xi32, #tpu.memory_space<smem>>, %arg3: memref<128xi32, #tpu.memory_space<smem>>, %arg4: memref<64x32xf32, #tpu.memory_space<vmem>>, %arg5: memref<8x32xf32, #tpu.memory_space<vmem>>, %arg6: memref<4x32xi32, #tpu.memory_space<vmem>>, %arg7: memref<64x32xf32, #tpu.memory_space<vmem>>, %arg8: memref<32x32xf32, #tpu.memory_space<vmem>>, %arg9: memref<32x32xf32, #tpu.memory_space<vmem>>, %arg10: memref<32x32xf32, #tpu.memory_space<vmem>>, %arg11: memref<64x1xf32, #tpu.memory_space<vmem>>, %arg12: memref<64x1xf32, #tpu.memory_space<vmem>>, %arg13: memref<64x1xf32, #tpu.memory_space<vmem>>) attributes {dimension_semantics = [#tpu.dimension_semantics<arbitrary>], iteration_bounds = array<i64: 4>, scalar_prefetch = 3 : i64, scratch_operands = 6 : i64, tpu.core_type = #tpu.core_type<tc>, window_params = [{pipeline_mode = #tpu.pipeline_mode<synchronous>, transform_indices = @transform_0, window_bounds = array<i64: 64, 32>}, {pipeline_mode = #tpu.pipeline_mode<synchronous>, transform_indices = @transform_1, window_bounds = array<i64: 8, 32>}, {pipeline_mode = #tpu.pipeline_mode<synchronous>, transform_indices = @transform_2, window_bounds = array<i64: 4, 32>}, {pipeline_mode = #tpu.pipeline_mode<synchronous>, transform_indices = @transform_3, window_bounds = array<i64: 64, 32>}]} {
    %c0_i32 = arith.constant 0 : i32
    %0 = arith.cmpi eq, %arg0, %c0_i32 : i32
    %1 = arith.extui %0 : i1 to i32
    %c0_i32_0 = arith.constant 0 : i32
    %2 = arith.cmpi ne, %1, %c0_i32_0 : i32
    scf.if %2 {
      %cst_36 = arith.constant 0.000000e+00 : f32
      %67 = vector.broadcast %cst_36 : f32 to vector<64x1xf32>
      %c0_37 = arith.constant 0 : index
      %c0_38 = arith.constant 0 : index
      %68 = vector.load %arg11[%c0_37, %c0_38] : memref<64x1xf32, #tpu.memory_space<vmem>>, vector<64x1xf32>
      tpu.vector_store %arg11[%c0_37, %c0_38], %67 {strides = array<i32>} : memref<64x1xf32, #tpu.memory_space<vmem>>, vector<64x1xf32>,
      %cst_39 = arith.constant 0.000000e+00 : f32
      %69 = vector.broadcast %cst_39 : f32 to vector<64x1xf32>
      %c0_40 = arith.constant 0 : index
      %c0_41 = arith.constant 0 : index
      %70 = vector.load %arg12[%c0_40, %c0_41] : memref<64x1xf32, #tpu.memory_space<vmem>>, vector<64x1xf32>
      tpu.vector_store %arg12[%c0_40, %c0_41], %69 {strides = array<i32>} : memref<64x1xf32, #tpu.memory_space<vmem>>, vector<64x1xf32>,
      %cst_42 = arith.constant 0.000000e+00 : f32
      %71 = vector.broadcast %cst_42 : f32 to vector<64x1xf32>
      %c0_43 = arith.constant 0 : index
      %c0_44 = arith.constant 0 : index
      %72 = vector.load %arg13[%c0_43, %c0_44] : memref<64x1xf32, #tpu.memory_space<vmem>>, vector<64x1xf32>
      tpu.vector_store %arg13[%c0_43, %c0_44], %71 {strides = array<i32>} : memref<64x1xf32, #tpu.memory_space<vmem>>, vector<64x1xf32>,
      %cst_45 = arith.constant 0.000000e+00 : f32
      %73 = vector.broadcast %cst_45 : f32 to vector<64x32xf32>
      %c0_46 = arith.constant 0 : index
      %c0_47 = arith.constant 0 : index
      %74 = vector.load %arg7[%c0_46, %c0_47] : memref<64x32xf32, #tpu.memory_space<vmem>>, vector<64x32xf32>
      tpu.vector_store %arg7[%c0_46, %c0_47], %73 {strides = array<i32>} : memref<64x32xf32, #tpu.memory_space<vmem>>, vector<64x32xf32>,
    } else {
    }
    %c32_i32 = arith.constant 32 : i32
    %3 = arith.muli %arg0, %c32_i32 : i32
    %c0_i32_1 = arith.constant 0 : i32
    %c32_i32_2 = arith.constant 32 : i32
    %4 = arith.addi %c0_i32_1, %c32_i32_2 : i32
    %c1_i32 = arith.constant 1 : i32
    scf.for %arg14 = %c0_i32_1 to %4 step %c1_i32  : i32 {
      %67 = arith.addi %3, %arg14 : i32
      %68 = arith.index_cast %67 : i32 to index
      %69 = memref.load %arg1[%68] : memref<128xi32, #tpu.memory_space<smem>>
      %70 = arith.index_cast %69 : i32 to index
      %c0_36 = arith.constant 0 : index
      %71 = vector.load %arg4[%70, %c0_36] : memref<64x32xf32, #tpu.memory_space<vmem>>, vector<1x32xf32>
      %72 = arith.index_cast %arg14 : i32 to index
      %c0_37 = arith.constant 0 : index
      %73 = vector.load %arg8[%72, %c0_37] : memref<32x32xf32, #tpu.memory_space<vmem>>, vector<1x32xf32>
      tpu.vector_store %arg8[%72, %c0_37], %71 {strides = array<i32>} : memref<32x32xf32, #tpu.memory_space<vmem>>, vector<1x32xf32>,
      %74 = arith.index_cast %67 : i32 to index
      %75 = memref.load %arg2[%74] : memref<128xi32, #tpu.memory_space<smem>>
      %76 = arith.index_cast %75 : i32 to index
      %c0_38 = arith.constant 0 : index
      %77 = vector.load %arg4[%76, %c0_38] : memref<64x32xf32, #tpu.memory_space<vmem>>, vector<1x32xf32>
      %78 = arith.index_cast %arg14 : i32 to index
      %c0_39 = arith.constant 0 : index
      %79 = vector.load %arg9[%78, %c0_39] : memref<32x32xf32, #tpu.memory_space<vmem>>, vector<1x32xf32>
      tpu.vector_store %arg9[%78, %c0_39], %77 {strides = array<i32>} : memref<32x32xf32, #tpu.memory_space<vmem>>, vector<1x32xf32>,
      %80 = arith.index_cast %67 : i32 to index
      %81 = memref.load %arg3[%80] : memref<128xi32, #tpu.memory_space<smem>>
      %82 = arith.index_cast %81 : i32 to index
      %c0_40 = arith.constant 0 : index
      %83 = vector.load %arg5[%82, %c0_40] : memref<8x32xf32, #tpu.memory_space<vmem>>, vector<1x32xf32>
      %84 = arith.index_cast %arg14 : i32 to index
      %c0_41 = arith.constant 0 : index
      %85 = vector.load %arg10[%84, %c0_41] : memref<32x32xf32, #tpu.memory_space<vmem>>, vector<1x32xf32>
      tpu.vector_store %arg10[%84, %c0_41], %83 {strides = array<i32>} : memref<32x32xf32, #tpu.memory_space<vmem>>, vector<1x32xf32>,
    }
    %c32_i32_3 = arith.constant 32 : i32
    %c0 = arith.constant 0 : index
    %c0_4 = arith.constant 0 : index
    %5 = vector.load %arg8[%c0, %c0_4] : memref<32x32xf32, #tpu.memory_space<vmem>>, vector<32x32xf32>
    %c0_5 = arith.constant 0 : index
    %c0_6 = arith.constant 0 : index
    %6 = vector.load %arg9[%c0_5, %c0_6] : memref<32x32xf32, #tpu.memory_space<vmem>>, vector<32x32xf32>
    %c0_7 = arith.constant 0 : index
    %c0_8 = arith.constant 0 : index
    %7 = vector.load %arg10[%c0_7, %c0_8] : memref<32x32xf32, #tpu.memory_space<vmem>>, vector<32x32xf32>
    %8 = arith.mulf %6, %7 : vector<32x32xf32>
    %9 = arith.mulf %5, %7 : vector<32x32xf32>
    %cst = arith.constant 1.000000e+00 : f32
    %10 = vector.broadcast %cst : f32 to vector<1x32xf32>
    %11 = arith.mulf %8, %8 : vector<32x32xf32>
    %cst_9 = arith.constant dense<0.000000e+00> : vector<1x32xf32>
    %12 = tpu.matmul %10, %11, %cst_9 {dimension_numbers = #tpu.dot_dimension_numbers<[1], [1], [0], [0], [0, 0, 1, 0], [], []>} : vector<1x32xf32>, vector<32x32xf32>, vector<1x32xf32> -> vector<1x32xf32>
    %13 = arith.mulf %9, %9 : vector<32x32xf32>
    %cst_10 = arith.constant dense<0.000000e+00> : vector<1x32xf32>
    %14 = tpu.matmul %10, %13, %cst_10 {dimension_numbers = #tpu.dot_dimension_numbers<[1], [1], [0], [0], [0, 0, 1, 0], [], []>} : vector<1x32xf32>, vector<32x32xf32>, vector<1x32xf32> -> vector<1x32xf32>
    %15 = arith.mulf %12, %14 : vector<1x32xf32>
    %16 = tpu.iota {dimensions = array<i32: 1>} : vector<1x32xi32>
    %17 = vector.broadcast %3 : i32 to vector<1x32xi32>
    %18 = arith.addi %17, %16 : vector<1x32xi32>
    %c100_i32 = arith.constant 100 : i32
    %19 = vector.broadcast %c100_i32 : i32 to vector<1x32xi32>
    %20 = arith.cmpi slt, %18, %19 : vector<1x32xi32>
    %cst_11 = arith.constant 0.000000e+00 : f32
    %21 = vector.broadcast %cst_11 : f32 to vector<1x32xf32>
    %22 = arith.select %20, %15, %21 : vector<1x32xi1>, vector<1x32xf32>
    %23 = arith.index_cast %arg0 : i32 to index
    %c0_12 = arith.constant 0 : index
    %24 = vector.load %arg6[%23, %c0_12] : memref<4x32xi32, #tpu.memory_space<vmem>>, vector<1x32xi32>
    %25 = tpu.iota {dimensions = array<i32: 0>} : vector<64x32xi32>
    %26 = vector.broadcast %24 : vector<1x32xi32> to vector<64x32xi32>
    %27 = arith.cmpi eq, %26, %25 : vector<64x32xi32>
    %28 = vector.broadcast %20 : vector<1x32xi1> to vector<64x32xi1>
    %29 = arith.andi %27, %28 : vector<64x32xi1>
    %30 = arith.extui %29 : vector<64x32xi1> to vector<64x32xi32>
    %31 = arith.sitofp %30 : vector<64x32xi32> to vector<64x32xf32>
    %c0_13 = arith.constant 0 : index
    %c0_14 = arith.constant 0 : index
    %32 = vector.load %arg11[%c0_13, %c0_14] : memref<64x1xf32, #tpu.memory_space<vmem>>, vector<64x1xf32>
    %cst_15 = arith.constant 0.000000e+00 : f32
    %33 = vector.shape_cast %22 : vector<1x32xf32> to vector<1x32xf32>
    %34 = vector.broadcast %33 : vector<1x32xf32> to vector<64x32xf32>
    %35 = vector.broadcast %cst_15 : f32 to vector<64x32xf32>
    %36 = arith.select %29, %34, %35 : vector<64x32xi1>, vector<64x32xf32>
    %cst_16 = arith.constant dense<0xFF800000> : vector<64xf32>
    %37 = vector.multi_reduction <maximumf>, %36, %cst_16 [1] : vector<64x32xf32> to vector<64xf32>
    %38 = vector.shape_cast %37 : vector<64xf32> to vector<64x1xf32>
    %39 = arith.maximumf %32, %38 : vector<64x1xf32>
    %40 = arith.subf %32, %39 : vector<64x1xf32>
    %41 = math.exp %40 : vector<64x1xf32>
    %cst_17 = arith.constant dense<0.000000e+00> : vector<1x32xf32>
    %42 = tpu.matmul %39, %31, %cst_17 {dimension_numbers = #tpu.dot_dimension_numbers<[0], [0], [1], [1], [0, 1, 1, 1], [], []>} : vector<64x1xf32>, vector<64x32xf32>, vector<1x32xf32> -> vector<1x32xf32>
    %43 = arith.subf %22, %42 : vector<1x32xf32>
    %44 = math.exp %43 : vector<1x32xf32>
    %cst_18 = arith.constant dense<0.000000e+00> : vector<64x1xf32>
    %45 = tpu.matmul %31, %44, %cst_18 {dimension_numbers = #tpu.dot_dimension_numbers<[1], [1], [0], [0], [0, 0, 1, 0], [], []>} : vector<64x32xf32>, vector<1x32xf32>, vector<64x1xf32> -> vector<64x1xf32>
    %46 = vector.broadcast %44 : vector<1x32xf32> to vector<64x32xf32>
    %47 = arith.mulf %31, %46 : vector<64x32xf32>
    %cst_19 = arith.constant dense<0.000000e+00> : vector<64x32xf32>
    %48 = tpu.matmul %47, %8, %cst_19 {dimension_numbers = #tpu.dot_dimension_numbers<[1], [0], [0], [1], [0, 0, 1, 1], [], []>} : vector<64x32xf32>, vector<32x32xf32>, vector<64x32xf32> -> vector<64x32xf32>
    %cst_20 = arith.constant dense<0.000000e+00> : vector<64xf32>
    %49 = vector.multi_reduction <add>, %31, %cst_20 [1] : vector<64x32xf32> to vector<64xf32>
    %50 = vector.shape_cast %49 : vector<64xf32> to vector<64x1xf32>
    %c0_21 = arith.constant 0 : index
    %c0_22 = arith.constant 0 : index
    %51 = vector.load %arg11[%c0_21, %c0_22] : memref<64x1xf32, #tpu.memory_space<vmem>>, vector<64x1xf32>
    tpu.vector_store %arg11[%c0_21, %c0_22], %39 {strides = array<i32>} : memref<64x1xf32, #tpu.memory_space<vmem>>, vector<64x1xf32>,
    %c0_23 = arith.constant 0 : index
    %c0_24 = arith.constant 0 : index
    %52 = vector.load %arg12[%c0_23, %c0_24] : memref<64x1xf32, #tpu.memory_space<vmem>>, vector<64x1xf32>
    %53 = arith.mulf %52, %41 : vector<64x1xf32>
    %54 = arith.addf %53, %45 : vector<64x1xf32>
    %c0_25 = arith.constant 0 : index
    %c0_26 = arith.constant 0 : index
    %55 = vector.load %arg12[%c0_25, %c0_26] : memref<64x1xf32, #tpu.memory_space<vmem>>, vector<64x1xf32>
    tpu.vector_store %arg12[%c0_25, %c0_26], %54 {strides = array<i32>} : memref<64x1xf32, #tpu.memory_space<vmem>>, vector<64x1xf32>,
    %c0_27 = arith.constant 0 : index
    %c0_28 = arith.constant 0 : index
    %56 = vector.load %arg13[%c0_27, %c0_28] : memref<64x1xf32, #tpu.memory_space<vmem>>, vector<64x1xf32>
    %57 = arith.addf %56, %50 : vector<64x1xf32>
    %c0_29 = arith.constant 0 : index
    %c0_30 = arith.constant 0 : index
    %58 = vector.load %arg13[%c0_29, %c0_30] : memref<64x1xf32, #tpu.memory_space<vmem>>, vector<64x1xf32>
    tpu.vector_store %arg13[%c0_29, %c0_30], %57 {strides = array<i32>} : memref<64x1xf32, #tpu.memory_space<vmem>>, vector<64x1xf32>,
    %c0_31 = arith.constant 0 : index
    %c0_32 = arith.constant 0 : index
    %59 = vector.load %arg7[%c0_31, %c0_32] : memref<64x32xf32, #tpu.memory_space<vmem>>, vector<64x32xf32>
    %60 = vector.broadcast %41 : vector<64x1xf32> to vector<64x32xf32>
    %61 = arith.mulf %59, %60 : vector<64x32xf32>
    %62 = arith.addf %61, %48 : vector<64x32xf32>
    %c0_33 = arith.constant 0 : index
    %c0_34 = arith.constant 0 : index
    %63 = vector.load %arg7[%c0_33, %c0_34] : memref<64x32xf32, #tpu.memory_space<vmem>>, vector<64x32xf32>
    tpu.vector_store %arg7[%c0_33, %c0_34], %62 {strides = array<i32>} : memref<64x32xf32, #tpu.memory_space<vmem>>, vector<64x32xf32>,
    %c3_i32 = arith.constant 3 : i32
    %64 = arith.cmpi eq, %arg0, %c3_i32 : i32
    %65 = arith.extui %64 : i1 to i32
    %c0_i32_35 = arith.constant 0 : i32
    %66 = arith.cmpi ne, %65, %c0_i32_35 : i32
    scf.if %66 {
      %c0_36 = arith.constant 0 : index
      %c0_37 = arith.constant 0 : index
      %67 = vector.load %arg13[%c0_36, %c0_37] : memref<64x1xf32, #tpu.memory_space<vmem>>, vector<64x1xf32>
      %c0_38 = arith.constant 0 : index
      %c0_39 = arith.constant 0 : index
      %68 = vector.load %arg12[%c0_38, %c0_39] : memref<64x1xf32, #tpu.memory_space<vmem>>, vector<64x1xf32>
      %69 = arith.mulf %68, %67 : vector<64x1xf32>
      %cst_40 = arith.constant 1.000000e-30 : f32
      %70 = vector.broadcast %cst_40 : f32 to vector<64x1xf32>
      %71 = arith.maximumf %69, %70 : vector<64x1xf32>
      %cst_41 = arith.constant 0.000000e+00 : f32
      %72 = vector.broadcast %cst_41 : f32 to vector<64x1xf32>
      %73 = arith.cmpf ogt, %67, %72 : vector<64x1xf32>
      %c0_42 = arith.constant 0 : index
      %c0_43 = arith.constant 0 : index
      %74 = vector.load %arg7[%c0_42, %c0_43] : memref<64x32xf32, #tpu.memory_space<vmem>>, vector<64x32xf32>
      %75 = vector.broadcast %71 : vector<64x1xf32> to vector<64x32xf32>
      %76 = arith.divf %74, %75 : vector<64x32xf32>
      %cst_44 = arith.constant 0.000000e+00 : f32
      %77 = vector.shape_cast %73 : vector<64x1xi1> to vector<64x1xi1>
      %78 = vector.broadcast %77 : vector<64x1xi1> to vector<64x32xi1>
      %79 = vector.broadcast %cst_44 : f32 to vector<64x32xf32>
      %80 = arith.select %78, %76, %79 : vector<64x32xi1>, vector<64x32xf32>
      %c0_45 = arith.constant 0 : index
      %c0_46 = arith.constant 0 : index
      %81 = vector.load %arg7[%c0_45, %c0_46] : memref<64x32xf32, #tpu.memory_space<vmem>>, vector<64x32xf32>
      tpu.vector_store %arg7[%c0_45, %c0_46], %80 {strides = array<i32>} : memref<64x32xf32, #tpu.memory_space<vmem>>, vector<64x32xf32>,
    } else {
    }
    return
  }
  func.func @transform_0(%arg0: i32, %arg1: memref<128xi32, #tpu.memory_space<smem>>, %arg2: memref<128xi32, #tpu.memory_space<smem>>, %arg3: memref<128xi32, #tpu.memory_space<smem>>) -> (i32, i32) {
    %c0_i32 = arith.constant 0 : i32
    %c0_i32_0 = arith.constant 0 : i32
    %c0_i32_1 = arith.constant 0 : i32
    return %c0_i32, %c0_i32_0 : i32, i32
  }
  func.func @transform_1(%arg0: i32, %arg1: memref<128xi32, #tpu.memory_space<smem>>, %arg2: memref<128xi32, #tpu.memory_space<smem>>, %arg3: memref<128xi32, #tpu.memory_space<smem>>) -> (i32, i32) {
    %c0_i32 = arith.constant 0 : i32
    %c0_i32_0 = arith.constant 0 : i32
    %c0_i32_1 = arith.constant 0 : i32
    return %c0_i32, %c0_i32_0 : i32, i32
  }
  func.func @transform_2(%arg0: i32, %arg1: memref<128xi32, #tpu.memory_space<smem>>, %arg2: memref<128xi32, #tpu.memory_space<smem>>, %arg3: memref<128xi32, #tpu.memory_space<smem>>) -> (i32, i32) {
    %c0_i32 = arith.constant 0 : i32
    %c0_i32_0 = arith.constant 0 : i32
    %c0_i32_1 = arith.constant 0 : i32
    return %c0_i32, %c0_i32_0 : i32, i32
  }
  func.func @transform_3(%arg0: i32, %arg1: memref<128xi32, #tpu.memory_space<smem>>, %arg2: memref<128xi32, #tpu.memory_space<smem>>, %arg3: memref<128xi32, #tpu.memory_space<smem>>) -> (i32, i32) {
    %c0_i32 = arith.constant 0 : i32
    %c0_i32_0 = arith.constant 0 : i32
    %c0_i32_1 = arith.constant 0 : i32
    return %c0_i32, %c0_i32_0 : i32, i32
  }
}

</mosaic_0001>

<bundles_post_ra>
// kernel: tpu_custom_call.1
= control target key start
LH: loop header
LB: loop body
LE: loop exit
PB: predicated region body
PF: predicated region fallthrough
CT: control target
= control target key end

     0   :  { %s2031_s0 = inlined_call_operand.vmem [shape: s32[128], index: 0, kind: input, shape index: {}]   ;;  %s2032_s3 = inlined_call_operand.vmem [shape: f32[64,32], index: 3, kind: input, shape index: {}]   ;;  %s2033_s4 = inlined_call_operand.vmem [shape: f32[8,32], index: 4, kind: input, shape index: {}]   ;;  %s2034_s5 = inlined_call_operand.vmem [shape: s32[4,32], index: 5, kind: input, shape index: {}]   ;;  %s2035_s6 = inlined_call_operand.vmem [shape: f32[64,32], index: 6, kind: output, shape index: {}]   ;;  %s2036_s1 = inlined_call_operand.vmem [shape: s32[128], index: 1, kind: input, shape index: {}]   ;;  %s2037_s2 = inlined_call_operand.vmem [shape: s32[128], index: 2, kind: input, shape index: {}]  }
   0x1   :  { %s11_s23 = sshll.u32 %s2031_s0, 4  ;;  %s15_s26 = sshll.u32 %s2036_s1, 4  ;;  %s12_s23 = int_to_ptr.vmem [resolvable:$true] %s11_s23  ;;  %s16_s26 = int_to_ptr.vmem [resolvable:$true] %s15_s26 }
   0x2   :  { %s1407_s27 = scalar_lea.vmem %s12_s23, 16  ;;  %p1412_p1 = scmp.lt.s32.totalorder %s12_s23, %s12_s23 }
   0x3   :  { %p1408_p0 = scmp.ne.s32.totalorder %s12_s23, %s1407_s27  ;;  %p1413_p2 = scmp.lt.s32.totalorder %s1407_s27, %s1407_s27 }
   0x5   :  { %p1414_p3 = por %p1413_p2, %p1412_p1 }
   0x7   :  { %p1415_p4 = pnand %p1414_p3, %p1408_p0 }
   0x9   :  { %1418 = shalt.err (!%p1415_p4)  }
   0xa   :  { %s1461_s28 = smov [#allocation9]   ;;  %s1419_s29 = scalar_lea.vmem %s16_s26, 16 }
   0xb   :  { %14 = dma.vmem_to_smem %s12_s23, 16, %s1461_s28, [#allocation8] }
   0xc   :  { %p1420_p5 = scmp.ne.s32.totalorder %s16_s26, %s1419_s29  ;;  %p1424_p6 = scmp.lt.s32.totalorder %s16_s26, %s16_s26 }
   0xd   :  { %p1425_p7 = scmp.lt.s32.totalorder %s1419_s29, %s1419_s29 }
   0xf   :  { %p1426_p8 = por %p1425_p7, %p1424_p6 }
  0x11   :  { %p1427_p9 = pnand %p1426_p8, %p1420_p5 }
  0x13   :  { %1430 = shalt.err (!%p1427_p9)  }
  0x14   :  { %s1462_s0 = smov [#allocation10]   ;;  %s19_s7 = sshll.u32 %s2037_s2, 4  ;;  %s20_s7 = int_to_ptr.vmem [resolvable:$true] %s19_s7 }
  0x15   :  { %18 = dma.vmem_to_smem %s16_s26, 16, %s1462_s0, [#allocation8] }
  0x16   :  { %s1431_s8 = scalar_lea.vmem %s20_s7, 16  ;;  %p1436_p11 = scmp.lt.s32.totalorder %s20_s7, %s20_s7 }
  0x17   :  { %p1432_p10 = scmp.ne.s32.totalorder %s20_s7, %s1431_s8  ;;  %p1437_p12 = scmp.lt.s32.totalorder %s1431_s8, %s1431_s8 }
  0x19   :  { %p1438_p13 = por %p1437_p12, %p1436_p11 }
  0x1b   :  { %p1439_p0 = pnand %p1438_p13, %p1432_p10 }
  0x1d   :  { %1442 = shalt.err (!%p1439_p0)  }
  0x1e   :  { %s1463_s9 = smov [#allocation11]  }
  0x1f   :  { %22 = dma.vmem_to_smem %s20_s7, 16, %s1463_s9, [#allocation8] }
  0x20   :  { %1451 = dma.done.wait [#allocation8], 48 }
  0x21   :  { %1452 = vsyncadd [#allocation8], 4294967248 }
  0x22   :  { %24 = sfence }
  0x23   :  { %s1516_s10 = smov 0  }
  0x24 LB: > { %s1522_s2 = sadd.s32 4294967295, %s1455_s10   ;;  %p1172_p1 = scmp.ge.s32.totalorder %s1455_s10, 1  ;;  %s1455_s10 = sphi %s1516_s10, %s30_s10  }
  0x25   : > { %p139_p2 = scmp.lt.s32.totalorder %s1455_s10, 5 }
  0x27   : > { %p140_p3 = pnand %p1172_p1, %p139_p2 }
  0x28   : > { %p1173_p4 = scmp.ne.s32.totalorder (!%p140_p3), %s1522_s2, 0 }
  0x29   : > { %143 = sbr.rel (%p140_p3) target bundleno = 1187 (0x4a3), region = 32 }
  0x30   : > { %156 = sbr.rel (%p1173_p4) target bundleno = 65 (0x41), region = 36  ;;  %vm157_vm0 = vcmask (!%p1173_p4), 7168   ;;  %vm182_vm1 = vcmask (!%p1173_p4), 261120   ;;  %v1464_v0 = vmov (!%p1173_p4), 0.0  }
  0x31   : > { %158 = vst.msk [vmem:[#allocation5] sm:$0xff] (!%p1173_p4), %vm157_vm0, %v1464_v0  ;;  %159 = vst.msk [vmem:[#allocation5 + $0x8] sm:$0xff] (!%p1173_p4), %vm157_vm0, %v1464_v0 }
  0x32   : > { %160 = vst.msk [vmem:[#allocation5 + $0x10] sm:$0xff] (!%p1173_p4), %vm157_vm0, %v1464_v0  ;;  %161 = vst.msk [vmem:[#allocation5 + $0x18] sm:$0xff] (!%p1173_p4), %vm157_vm0, %v1464_v0 }
  0x33   : > { %162 = vst.msk [vmem:[#allocation5 + $0x20] sm:$0xff] (!%p1173_p4), %vm157_vm0, %v1464_v0  ;;  %163 = vst.msk [vmem:[#allocation5 + $0x28] sm:$0xff] (!%p1173_p4), %vm157_vm0, %v1464_v0 }
  0x34   : > { %164 = vst.msk [vmem:[#allocation5 + $0x30] sm:$0xff] (!%p1173_p4), %vm157_vm0, %v1464_v0  ;;  %165 = vst.msk [vmem:[#allocation5 + $0x38] sm:$0xff] (!%p1173_p4), %vm157_vm0, %v1464_v0 }
  0x35   : > { %166 = vst.msk [vmem:[#allocation6] sm:$0xff] (!%p1173_p4), %vm157_vm0, %v1464_v0  ;;  %167 = vst.msk [vmem:[#allocation6 + $0x8] sm:$0xff] (!%p1173_p4), %vm157_vm0, %v1464_v0 }
  0x36   : > { %168 = vst.msk [vmem:[#allocation6 + $0x10] sm:$0xff] (!%p1173_p4), %vm157_vm0, %v1464_v0  ;;  %169 = vst.msk [vmem:[#allocation6 + $0x18] sm:$0xff] (!%p1173_p4), %vm157_vm0, %v1464_v0 }
  0x37   : > { %170 = vst.msk [vmem:[#allocation6 + $0x20] sm:$0xff] %vm157_vm0, %v1464_v0  ;;  %171 = vst.msk [vmem:[#allocation6 + $0x28] sm:$0xff] %vm157_vm0, %v1464_v0 }
  0x38   : > { %172 = vst.msk [vmem:[#allocation6 + $0x30] sm:$0xff] %vm157_vm0, %v1464_v0  ;;  %173 = vst.msk [vmem:[#allocation6 + $0x38] sm:$0xff] %vm157_vm0, %v1464_v0 }
  0x39   : > { %174 = vst.msk [vmem:[#allocation7] sm:$0xff] %vm157_vm0, %v1464_v0  ;;  %175 = vst.msk [vmem:[#allocation7 + $0x8] sm:$0xff] %vm157_vm0, %v1464_v0 }
  0x3a   : > { %176 = vst.msk [vmem:[#allocation7 + $0x10] sm:$0xff] %vm157_vm0, %v1464_v0  ;;  %177 = vst.msk [vmem:[#allocation7 + $0x18] sm:$0xff] %vm157_vm0, %v1464_v0 }
  0x3b   : > { %178 = vst.msk [vmem:[#allocation7 + $0x20] sm:$0xff] %vm157_vm0, %v1464_v0  ;;  %179 = vst.msk [vmem:[#allocation7 + $0x28] sm:$0xff] %vm157_vm0, %v1464_v0 }
  0x3c   : > { %180 = vst.msk [vmem:[#allocation7 + $0x30] sm:$0xff] %vm157_vm0, %v1464_v0  ;;  %181 = vst.msk [vmem:[#allocation7 + $0x38] sm:$0xff] %vm157_vm0, %v1464_v0 }
  0x3d   : > { %183 = vst.msk [vmem:[%s2035_s6] sm:$0xff] %vm182_vm1, %v1464_v0  ;;  %184 = vst.msk [vmem:[%s2035_s6 + $0x8] sm:$0xff] %vm182_vm1, %v1464_v0 }
  0x3e   : > { %185 = vst.msk [vmem:[%s2035_s6 + $0x10] sm:$0xff] %vm182_vm1, %v1464_v0  ;;  %186 = vst.msk [vmem:[%s2035_s6 + $0x18] sm:$0xff] %vm182_vm1, %v1464_v0 }
  0x3f   : > { %187 = vst.msk [vmem:[%s2035_s6 + $0x20] sm:$0xff] %vm182_vm1, %v1464_v0  ;;  %188 = vst.msk [vmem:[%s2035_s6 + $0x28] sm:$0xff] %vm182_vm1, %v1464_v0 }
  0x40   : > { %189 = vst.msk [vmem:[%s2035_s6 + $0x30] sm:$0xff] %vm182_vm1, %v1464_v0  ;;  %190 = vst.msk [vmem:[%s2035_s6 + $0x38] sm:$0xff] %vm182_vm1, %v1464_v0 }
  0x41 PF: > { %s1174_s27 = sshll.u32 %s1522_s2, 5  ;;  %s1457_s28 = smov 0  }
  0x42 LB: >> { %s198_s29 = sadd.s32 %s1459_s28, %s1174_s27  ;;  %vm203_vm2 = vcmask 253952   ;;  %s202_s17 = scalar_lea.vmem [#allocation2], %s1459_s28  ;;  %s1459_s28 = sphi %s1457_s28, %s197_s28  }
  0x43   : >> { %s199_s0 = sld [smem:[#allocation9 + %s198_s29]]  ;;  %s208_s18 = scalar_lea.vmem [#allocation3], %s1459_s28 }
  0x44   : >> { %s205_s1 = sld [smem:[#allocation10 + %s198_s29]]  ;;  %s213_s19 = scalar_lea.vmem [#allocation4], %s1459_s28 }
  0x45   : >> { %s210_s30 = sld [smem:[#allocation11 + %s198_s29]]  ;;  %s197_s28 = sadd.s32 1, %s1459_s28  }
  0x46   : >> { %p194_p5 = scmp.ge.s32.totalorder %s197_s28, 32  }
  0x47   : > { %v1465_v7 = vmov (%p194_p5), 0.0|0.0   ;;  %vm239_vm3 = vcmask (%p194_p5), 261120   ;;  %vm1466_vm4 = vmmov (%p194_p5), 0   ;;  %v1467_v16 = vmov (%p194_p5), 0.0   ;;  %s418_s22 = scalar_lea.vmem (%p194_p5), %s2034_s5, %s1522_s2  ;;  %v472_v61 = vld [vmem:[#allocation5 + $0x28] sm:$0xff] (%p194_p5)  ;;  %v471_v62 = vld [vmem:[#allocation5 + $0x20] sm:$0xff] (%p194_p5) }
  0x48   : > { %196 = sbr.rel (!%p194_p5) target bundleno = 66 (0x42), region = 77  ;;  %1306 = vmatprep.subr.bf16.mxu0 (%p194_p5), %v1465_v7  ;;  %1314 = vmatprep.subr.bf16.mxu1 (%p194_p5), %v1465_v7  ;;  %vm1615_vm5 = vmpackc.low (%p194_p5), %vm239_vm3, %vm239_vm3  ;;  %v1468_v39 = vmov (%p194_p5), 1.0   ;;  %v412_v40 = vlaneseq (%p194_p5)  ;;  %v414_v43 = vstv (%p194_p5), %s1174_s27  ;;  %v1185_v46 = vld [vmem:[%s418_s22] ss:$0 sm:$0xff] (%p194_p5)  ;;  %p1211_p6 = scmp.ne.s32.totalorder (%p194_p5), %s1522_s2, 3 }
  0x49   : >> { %s200_s9 = scalar_lea.vmem %s2032_s3, %s199_s0  ;;  %1253 = vmatprep.mubr.msk.f32.mxu0 (%p194_p5), %vm1466_vm4, %v1467_v16  ;;  %1264 = vmatprep.mubr.msk.f32.mxu1 (%p194_p5), %vm1466_vm4, %v1467_v16 }
  0x4a   : >> { %s206_s13 = scalar_lea.vmem %s2032_s3, %s205_s1  ;;  %v201_v1 = vld [vmem:[%s200_s9] sm:$0x1]  ;;  %v1638_v41 = vshrl.u32 (%p194_p5), %v412_v40, 7  ;;  %v413_v42 = vand.u32 (%p194_p5), 127, %v412_v40 }
  0x4b   : >> { %v207_v2 = vld [vmem:[%s206_s13] sm:$0x1]  ;;  %s211_s16 = scalar_lea.vmem %s2033_s4, %s210_s30  ;;  %204 = vst.msk [vmem:[%s202_s17] sm:$0x1] %vm203_vm2, %v201_v1 }
  0x4c   : >> { %209 = vst.msk [vmem:[%s208_s18] sm:$0x1] %vm203_vm2, %v207_v2  ;;  %v212_v3 = vld [vmem:[%s211_s16] sm:$0x1]  ;;  %v423_v44 = vadd.s32 (%p194_p5), 16, %v1638_v41  ;;  %v415_v45 = vadd.s32 (%p194_p5), %v414_v43, %v413_v42  ;;  %v424_v47 = vadd.s32 (%p194_p5), 24, %v1638_v41  ;;  %vm433_vm8 = vcmp.eq.s32.totalorder (%p194_p5), %v1185_v46, %v1638_v41 }
  0x4d   : >> { %214 = vst.msk [vmem:[%s213_s19] sm:$0x1] %vm203_vm2, %v212_v3  ;;  %v422_v48 = vadd.s32 (%p194_p5), 8, %v1638_v41  ;;  %v477_v51 = vsub.s32 (%p194_p5), 0, %v1638_v41  ;;  %v426_v55 = vadd.s32 (%p194_p5), 40, %v1638_v41  ;;  %v425_v57 = vadd.s32 (%p194_p5), 32, %v1638_v41 }
  0x4e   : > { %vm435_vm6 = vcmp.eq.s32.totalorder (%p194_p5), %v1185_v46, %v423_v44  ;;  %vm416_vm7 = vcmp.lt.s32.totalorder (%p194_p5), %v415_v45, 100  ;;  %vm436_vm9 = vcmp.eq.s32.totalorder (%p194_p5), %v1185_v46, %v424_v47  ;;  %v428_v63 = vadd.s32 (%p194_p5), 56, %v1638_v41 }
  0x4f   : > { %vm1653_vm10 = vmand %vm435_vm6, %vm416_vm7  ;;  %vm434_vm11 = vcmp.eq.s32.totalorder %v1185_v46, %v422_v48  ;;  %vm438_vm15 = vcmp.eq.s32.totalorder %v1185_v46, %v426_v55  ;;  %vm437_vm0 = vcmp.eq.s32.totalorder %v1185_v46, %v425_v57  ;;  %v427_v2 = vadd.s32 48, %v1638_v41 }
  0x50   : > { %vm1662_vm12 = vmand %vm433_vm8, %vm416_vm7  ;;  %v1470_v45 = vmov 1.0|1.0  }
  0x51   : > { %vm1670_vm13 = vmand %vm436_vm9, %vm416_vm7 }
  0x52   : > { %v215_v10 = vld [vmem:[#allocation2] sm:$0xff]  ;;  %v216_v12 = vld [vmem:[#allocation2 + $0x8] sm:$0xff]  ;;  %v217_v21 = vld [vmem:[#allocation2 + $0x10] sm:$0xff] }
  0x53   : > { %v219_v4 = vld [vmem:[#allocation3] sm:$0xff]  ;;  %v220_v5 = vld [vmem:[#allocation3 + $0x8] sm:$0xff]  ;;  %v221_v14 = vld [vmem:[#allocation3 + $0x10] sm:$0xff] }
  0x54   : > { %v223_v6 = vld [vmem:[#allocation4] sm:$0xff]  ;;  %v224_v8 = vld [vmem:[#allocation4 + $0x8] sm:$0xff]  ;;  %v222_v15 = vld [vmem:[#allocation3 + $0x18] sm:$0xff] }
  0x55   : > { %v1597_v9 = vmul.f32 %v223_v6, %v219_v4  ;;  %v1599_v11 = vmul.f32 %v224_v8, %v220_v5  ;;  %v231_v13 = vmul.f32 %v223_v6, %v215_v10  ;;  %v232_v18 = vmul.f32 %v224_v8, %v216_v12  ;;  %v225_v19 = vld [vmem:[#allocation4 + $0x10] sm:$0xff]  ;;  %v226_v20 = vld [vmem:[#allocation4 + $0x18] sm:$0xff]  ;;  %vm1675_vm14 = vmand %vm434_vm11, %vm416_vm7 }
  0x56   : > { %v1609_v24 = vmul.f32 %v225_v19, %v221_v14  ;;  %v1611_v25 = vmul.f32 %v226_v20, %v222_v15  ;;  %v218_v26 = vld [vmem:[#allocation2 + $0x18] sm:$0xff]  ;;  %v233_v29 = vmul.f32 %v225_v19, %v217_v21  ;;  %vm1692_vm1 = vmand %vm438_vm15, %vm416_vm7 }
  0x57   : > { %v235_v17 = vmul.f32 %v1597_v9, %v1597_v9  ;;  %v236_v22 = vmul.f32 %v1599_v11, %v1599_v11  ;;  %v325_v23 = vmul.f32 %v231_v13, %v231_v13  ;;  %v326_v28 = vmul.f32 %v232_v18, %v232_v18  ;;  %vm1697_vm2 = vmand %vm437_vm0, %vm416_vm7 }
  0x58   : > { %v234_v30 = vmul.f32 %v226_v20, %v218_v26  ;;  %v237_v33 = vmul.f32 %v1609_v24, %v1609_v24  ;;  %v238_v34 = vmul.f32 %v1611_v25, %v1611_v25  ;;  %v327_v35 = vmul.f32 %v233_v29, %v233_v29  ;;  %vm1326_vm9 = vmpackc.low %vm1670_vm13, %vm1653_vm10 }
  0x59   : > { %v1307_v31 = vpack.c.bf16 %v236_v22, %v235_v17  ;;  %v1315_v32 = vpack.c.bf16 %v326_v28, %v325_v23  ;;  %v1726_v23 = vsel %vm1662_vm12, 1.0, %v1467_v16  ;;  %v1735_v29 = vsel %vm1675_vm14, 1.0, %v1467_v16  ;;  %vm1329_vm11 = vmpackc.low %vm1692_vm1, %vm1697_vm2  ;;  %v882_v17 = vld [vmem:[#allocation7] sm:$0xff] }
  0x5a   : > { %v328_v36 = vmul.f32 %v234_v30, %v234_v30  ;;  %v1311_v37 = vpack.c.bf16 %v238_v34, %v237_v33  ;;  %v817_v28 = vsel %vm239_vm3, %v1726_v23, 0.0  ;;  %v820_v30 = vsel %vm239_vm3, %v1735_v29, 0.0 }
  0x5b   : > { %1309 = vmatpush3.bf16.xpose.msk.msra.mxu0 %vm1615_vm5, %v1307_v31  ;;  %1317 = vmatpush3.bf16.xpose.msk.msra.mxu1 %vm1615_vm5, %v1315_v32  ;;  %v1742_v31 = vsel %vm1653_vm10, 1.0, %v1467_v16  ;;  %v1749_v33 = vsel %vm1670_vm13, 1.0, %v1467_v16 }
  0x5c   : > { %1310 = vmatprep.subr.bf16.mxu0 %v1465_v7  ;;  %1318 = vmatprep.subr.bf16.mxu1 %v1465_v7  ;;  %v1319_v38 = vpack.c.bf16 %v328_v36, %v327_v35  ;;  %v823_v32 = vsel %vm239_vm3, %v1742_v31, 0.0  ;;  %v826_v34 = vsel %vm239_vm3, %v1749_v33, 0.0  ;;  %v1756_v35 = vsel %vm1697_vm2, 1.0, %v1467_v16 }
  0x5d   : > { %v829_v36 = vsel %vm239_vm3, %v1756_v35, 0.0 }
  0x63   : > { %1313 = vmatpush3.bf16.xpose.msk.msra.mxu0 %vm1615_vm5, %v1311_v37  ;;  %1321 = vmatpush3.bf16.xpose.msk.msra.mxu1 %vm1615_vm5, %v1319_v38  ;;  %vm439_vm5 = vcmp.eq.s32.totalorder %v1185_v46, %v427_v2  ;;  %v1763_v37 = vsel %vm1692_vm1, 1.0, %v1467_v16 }
  0x64   : > { %1322 = vmatprep.subr.bf16.mxu0 %v1465_v7  ;;  %vm1713_vm8 = vmand %vm439_vm5, %vm416_vm7  ;;  %v832_v38 = vsel %vm239_vm3, %v1763_v37, 0.0 }
  0x65   : > { %v1771_v40 = vsel %vm1713_vm8, 1.0, %v1467_v16 }
  0x66   : > { %v835_v42 = vsel %vm239_vm3, %v1771_v40, 0.0 }
  0x6a   : > { %1254 = vmatmul.mubr.msk.f32.vlgmr.msra.gmra.mrb[0].mxu0 %vm239_vm3, %v1468_v39  ;;  %1265 = vmatmul.mubr.msk.f32.vlgmr.msra.gmra.mrb[0].mxu1 %vm239_vm3, %v1468_v39  ;;  %v1469_v39 = vmov 0  }
  0x6b   : > { %1283 = vmatprep.mubr.msk.f32.mxu0 %vm1466_vm4, %v1467_v16  ;;  %vm440_vm4 = vcmp.eq.s32.totalorder %v1185_v46, %v428_v63  ;;  %1369 = vset.pattern.permute.xlu1 %v1469_v39  ;;  %v467_v46 = vld [vmem:[#allocation5] sm:$0xff] }
  0x6c   : > { %vm1708_vm6 = vmand %vm440_vm4, %vm416_vm7 }
  0x6d   : > { %v1778_v43 = vsel %vm1708_vm6, 1.0, %v1467_v16  ;;  %v469_v16 = vld [vmem:[#allocation5 + $0x10] sm:$0xff] }
  0x6e   : > { %v838_v44 = vsel %vm239_vm3, %v1778_v43, 0.0 }
 0x13d   : > { %v321_v49 = vpop.f32.mrb[0].mxu0  ;;  %v407_v50 = vpop.f32.mrb[0].mxu1 }
 0x13e   : > { %v1255_v52 = vpop.f32.mrb[1].mxu0  ;;  %v411_v53 = vmul.f32 %v407_v50, %v321_v49  ;;  %v1266_v54 = vpop.f32.mrb[1].mxu1 }
 0x13f   : > { %v470_v52 = vld [vmem:[#allocation5 + $0x18] sm:$0xff] }
 0x140   : > { %v1659_v58 = vsel %vm416_vm7, %v411_v53, 0.0  ;;  %vm1323_vm7 = vmpackc.low %vm1675_vm14, %vm1662_vm12  ;;  %v1801_v53 = vld [vmem:[#allocation5 + $0x8] sm:$0xff] }
 0x141   : > { %v478_v60 = vrot.slane %v1659_v58, %v477_v51  ;;  %1324 = vmatpush3.bf16.msk.msra.mxu0 %vm1323_vm7, %v1470_v45 }
 0x142   : > { %1325 = vmatprep.subr.bf16.mxu0 %v1465_v7 }
 0x143   : > { %v481_v0 = vsel %vm1653_vm10, %v478_v60, 0.0  ;;  %v479_v1 = vsel %vm1662_vm12, %v478_v60, 0.0  ;;  %v482_v5 = vsel %vm1670_vm13, %v478_v60, 0.0  ;;  %v480_v6 = vsel %vm1675_vm14, %v478_v60, 0.0  ;;  %vm1332_vm12 = vmpackc.low %vm1708_vm6, %vm1713_vm8 }
 0x144   : > { %v493_v3 = vsel %vm239_vm3, %v481_v0, -inf  ;;  %v487_v4 = vsel %vm239_vm3, %v479_v1, -inf  ;;  %v496_v12 = vsel %vm239_vm3, %v482_v5, -inf  ;;  %v490_v13 = vsel %vm239_vm3, %v480_v6, -inf  ;;  %v1812_v5 = vld [vmem:[#allocation5 + $0x38] sm:$0xff]  ;;  %v473_v6 = vld [vmem:[#allocation5 + $0x30] sm:$0xff] }
 0x145   : > { %494 = vmax.xlane.f32.xlu1 %v493_v3  ;;  %488 = vmax.xlane.f32.xlu0 %v487_v4  ;;  %v484_v14 = vsel %vm1692_vm1, %v478_v60, 0.0  ;;  %v483_v15 = vsel %vm1697_vm2, %v478_v60, 0.0  ;;  %v486_v21 = vsel %vm1708_vm6, %v478_v60, 0.0  ;;  %v485_v22 = vsel %vm1713_vm8, %v478_v60, 0.0 }
 0x146   : > { %v502_v19 = vsel %vm239_vm3, %v484_v14, -inf  ;;  %v499_v20 = vsel %vm239_vm3, %v483_v15, -inf  ;;  %v508_v26 = vsel %vm239_vm3, %v486_v21, -inf  ;;  %v505_v27 = vsel %vm239_vm3, %v485_v22, -inf  ;;  %1327 = vmatpush3.bf16.msk.msra.mxu0 %vm1326_vm9, %v1470_v45 }
 0x147   : > { %1328 = vmatprep.subr.bf16.mxu0 %v1465_v7  ;;  %vm841_vm10 = vcmask 7168   ;;  %vm575_vm13 = vcmask 523264  }
 0x149   : > { %497 = vmax.xlane.f32.xlu1 %v496_v12  ;;  %491 = vmax.xlane.f32.xlu0 %v490_v13 }
 0x14a   : > { %1330 = vmatpush3.bf16.msk.msra.mxu0 %vm1329_vm11, %v1470_v45 }
 0x14b   : > { %1331 = vmatprep.subr.bf16.mxu0 %v1465_v7 }
 0x14d   : > { %503 = vmax.xlane.f32.xlu1 %v502_v19  ;;  %500 = vmax.xlane.f32.xlu0 %v499_v20 }
 0x14e   : > { %1333 = vmatpush3.bf16.msk.msra.mxu0 %vm1332_vm12, %v1470_v45 }
 0x151   : > { %509 = vmax.xlane.f32.xlu1 %v508_v26  ;;  %506 = vmax.xlane.f32.xlu0 %v505_v27  ;;  %v883_v27 = vld [vmem:[#allocation7 + $0x8] sm:$0xff] }
 0x155   : > { %818 = vadd.xlane.f32.xlu1 %v817_v28 }
 0x159   : > { %821 = vadd.xlane.f32.xlu1 %v820_v30 }
 0x15d   : > { %824 = vadd.xlane.f32.xlu1 %v823_v32 }
 0x161   : > { %827 = vadd.xlane.f32.xlu1 %v826_v34 }
 0x165   : > { %830 = vadd.xlane.f32.xlu1 %v829_v36 }
 0x169   : > { %833 = vadd.xlane.f32.xlu1 %v832_v38  ;;  %v884_v38 = vld [vmem:[#allocation7 + $0x10] sm:$0xff] }
 0x16d   : > { %836 = vadd.xlane.f32.xlu1 %v835_v42 }
 0x171   : > { %839 = vadd.xlane.f32.xlu1 %v838_v44 }
 0x1d2   : > { %v495_v47 = vpop.xlane.xlu1 %494  ;;  %v489_v48 = vpop.xlane.xlu0 %488 }
 0x1d3   : > { %v513_v49 = vmax.f32 %v469_v16, %v495_v47  ;;  %v511_v50 = vmax.f32 %v467_v46, %v489_v48 }
 0x1d5   : > { %844 = vst.msk [vmem:[#allocation5 + $0x10] sm:$0xff] %vm841_vm10, %v513_v49  ;;  %v519_v54 = vsub.f32 %v467_v46, %v511_v50  ;;  %842 = vst.msk [vmem:[#allocation5] sm:$0xff] %vm841_vm10, %v511_v50  ;;  %543 = vxpose.xlu0.b32.start [1/8] (short) (narrow) %v511_v50, 8  ;;  %v521_v7 = vsub.f32 %v469_v16, %v513_v49  ;;  %v885_v46 = vld [vmem:[#allocation7 + $0x18] sm:$0xff]  ;;  %v886_v50 = vld [vmem:[#allocation7 + $0x20] sm:$0xff] }
 0x1d6   : > { %v498_v55 = vpop.xlane.xlu1 %497  ;;  %v492_v56 = vpop.xlane.xlu0 %491 }
 0x1d7   : > { %v527_v57 = vmul.f32 1.442695, %v519_v54  ;;  %v514_v59 = vmax.f32 %v470_v52, %v498_v55  ;;  %v1806_v60 = vmax.f32 %v1801_v53, %v492_v56  ;;  %v531_v63 = vmul.f32 1.442695, %v521_v7  ;;  %v887_v55 = vld [vmem:[#allocation7 + $0x28] sm:$0xff] }
 0x1d9   : > { %845 = vst.msk [vmem:[#allocation5 + $0x18] sm:$0xff] %vm841_vm10, %v514_v59  ;;  %843 = vst.msk [vmem:[#allocation5 + $0x8] sm:$0xff] %vm841_vm10, %v1806_v60  ;;  %544 = vxpose.xlu0.b32.cont [2/8] (short) (narrow) %v1806_v60, 8  ;;  %1371 = vpow2.f32 %v527_v57  ;;  %v522_v0 = vsub.f32 %v470_v52, %v514_v59 }
 0x1da   : > { %v504_v1 = vpop.xlane.xlu1 %503  ;;  %v501_v2 = vpop.xlane.xlu0 %500  ;;  %1373 = vpow2.f32 %v531_v63 }
 0x1db   : > { %v516_v3 = vmax.f32 %v472_v61, %v504_v1  ;;  %v515_v4 = vmax.f32 %v471_v62, %v501_v2  ;;  %v533_v8 = vmul.f32 1.442695, %v522_v0  ;;  %v889_v0 = vld [vmem:[#allocation7 + $0x38] sm:$0xff] }
 0x1dd   : > { %847 = vst.msk [vmem:[#allocation5 + $0x28] sm:$0xff] %vm841_vm10, %v516_v3  ;;  %846 = vst.msk [vmem:[#allocation5 + $0x20] sm:$0xff] %vm841_vm10, %v515_v4  ;;  %545 = vxpose.xlu0.b32.cont [3/8] (short) (narrow) %v513_v49, 8  ;;  %v523_v10 = vsub.f32 %v471_v62, %v515_v4  ;;  %1375 = vpow2.f32 %v533_v8  ;;  %v524_v19 = vsub.f32 %v472_v61, %v516_v3  ;;  %v888_v61 = vld [vmem:[#allocation7 + $0x30] sm:$0xff] }
 0x1de   : > { %v510_v12 = vpop.xlane.xlu1 %509  ;;  %v507_v13 = vpop.xlane.xlu0 %506 }
 0x1df   : > { %v1817_v14 = vmax.f32 %v1812_v5, %v510_v12  ;;  %v517_v15 = vmax.f32 %v473_v6, %v507_v13  ;;  %v535_v20 = vmul.f32 1.442695, %v523_v10  ;;  %v537_v28 = vmul.f32 1.442695, %v524_v19 }
 0x1e0   : > { %v1334_v10 = vpack.c.bf16 %v1599_v11, %v1597_v9  ;;  %v1338_v12 = vpack.c.bf16 %v1611_v25, %v1609_v24 }
 0x1e1   : > { %v526_v18 = vsub.f32 %v1812_v5, %v1817_v14  ;;  %849 = vst.msk [vmem:[#allocation5 + $0x38] sm:$0xff] %vm841_vm10, %v1817_v14  ;;  %848 = vst.msk [vmem:[#allocation5 + $0x30] sm:$0xff] %vm841_vm10, %v517_v15  ;;  %546 = vxpose.xlu0.b32.cont [4/8] (short) (narrow) %v514_v59, 8  ;;  %1377 = vpow2.f32 %v535_v20  ;;  %v525_v30 = vsub.f32 %v473_v6, %v517_v15 }
 0x1e2   : > { %v819_v21 = vpop.xlane.xlu1 %818  ;;  %1379 = vpow2.f32 %v537_v28  ;;  %1335 = vmatprep.subr.bf16.mxu1 %v1334_v10 }
 0x1e3   : > { %v890_v22 = vadd.f32 %v882_v17, %v819_v21  ;;  %v1824_v26 = vpop.eup %1371  ;;  %v539_v42 = vmul.f32 1.442695, %v525_v30  ;;  %1337 = vmatpush3.bf16.msra.mxu1 %v1334_v10 }
 0x1e4   : > { %916 = vperm.xlu1 %1369, %v1824_v26   ;;  %v1828_v36 = vpop.eup %1373  ;;  %1339 = vmatprep.subr.bf16.mxu1 %v1338_v12 }
 0x1e5   : > { %547 = vxpose.xlu0.b32.cont [5/8] (short) (narrow) %v515_v4, 8  ;;  %898 = vst.msk [vmem:[#allocation7] sm:$0xff] %vm841_vm10, %v890_v22  ;;  %1381 = vpow2.f32 %v539_v42 }
 0x1e6   : > { %v822_v32 = vpop.xlane.xlu1 %821 }
 0x1e7   : > { %v891_v34 = vadd.f32 %v883_v27, %v822_v32  ;;  %v1832_v16 = vpop.eup %1375  ;;  %1341 = vmatpush3.bf16.msra.mxu1 %v1338_v12 }
 0x1e8   : > { %926 = vperm.xlu1 %1369, %v1828_v36  }
 0x1e9   : > { %548 = vxpose.xlu0.b32.cont [6/8] (short) (narrow) %v516_v3, 8  ;;  %899 = vst.msk [vmem:[#allocation7 + $0x8] sm:$0xff] %vm841_vm10, %v891_v34  ;;  %v520_v3 = vsub.f32 %v1801_v53, %v1806_v60 }
 0x1ea   : > { %v825_v44 = vpop.xlane.xlu1 %824 }
 0x1eb   : > { %v892_v45 = vadd.f32 %v884_v38, %v825_v44  ;;  %v1836_v49 = vpop.eup %1377  ;;  %v529_v4 = vmul.f32 1.442695, %v520_v3  ;;  %v850_v38 = vld [vmem:[#allocation6] sm:$0xff] }
 0x1ec   : > { %931 = vperm.xlu1 %1369, %v1832_v16   ;;  %v1841_v7 = vpop.eup %1379  ;;  %v858_v42 = vmul.f32 %v1824_v26, %v850_v38 }
 0x1ed   : > { %549 = vxpose.xlu0.b32.cont [7/8] (short) (narrow) %v517_v15, 8  ;;  %900 = vst.msk [vmem:[#allocation7 + $0x10] sm:$0xff] %vm841_vm10, %v892_v45  ;;  %1383 = vpow2.f32 %v529_v4  ;;  %v851_v45 = vld [vmem:[#allocation6 + $0x8] sm:$0xff] }
 0x1ee   : > { %v828_v47 = vpop.xlane.xlu1 %827 }
 0x1ef   : > { %v893_v48 = vadd.f32 %v885_v46, %v828_v47  ;;  %v1845_v59 = vpop.eup %1381 }
 0x1f0   : > { %936 = vperm.xlu1 %1369, %v1836_v49  }
 0x1f1   : > { %550 = vxpose.xlu0.b32.end [8/8] (short) (narrow) %v1817_v14, 8  ;;  %901 = vst.msk [vmem:[#allocation7 + $0x18] sm:$0xff] %vm841_vm10, %v893_v48 }
 0x1f2   : > { %v831_v52 = vpop.xlane.xlu1 %830 }
 0x1f3   : > { %v894_v54 = vadd.f32 %v886_v50, %v831_v52  ;;  %v853_v52 = vld [vmem:[#allocation6 + $0x18] sm:$0xff] }
 0x1f4   : > { %941 = vperm.xlu1 %1369, %v1841_v7   ;;  %v861_v26 = vmul.f32 %v1832_v16, %v853_v52 }
 0x1f5   : > { %902 = vst.msk [vmem:[#allocation7 + $0x20] sm:$0xff] %vm841_vm10, %v894_v54 }
 0x1f6   : > { %v834_v56 = vpop.xlane.xlu1 %833 }
 0x1f7   : > { %v895_v57 = vadd.f32 %v887_v55, %v834_v56  ;;  %v1853_v6 = vpop.eup %1383  ;;  %v854_v56 = vld [vmem:[#allocation6 + $0x20] sm:$0xff] }
 0x1f8   : > { %946 = vperm.xlu1 %1369, %v1845_v59   ;;  %v859_v5 = vmul.f32 %v1853_v6, %v851_v45 }
 0x1f9   : > { %903 = vst.msk [vmem:[#allocation7 + $0x28] sm:$0xff] %vm841_vm10, %v895_v57 }
 0x1fa   : > { %v837_v62 = vpop.xlane.xlu1 %836 }
 0x1fb   : > { %v896_v63 = vadd.f32 %v888_v61, %v837_v62  ;;  %v862_v61 = vmul.f32 %v1836_v49, %v854_v56 }
 0x1fd   : > { %904 = vst.msk [vmem:[#allocation7 + $0x30] sm:$0xff] %vm841_vm10, %v896_v63  ;;  %v855_v63 = vld [vmem:[#allocation6 + $0x28] sm:$0xff] }
 0x1fe   : > { %v840_v1 = vpop.xlane.xlu1 %839 }
 0x1ff   : > { %v897_v2 = vadd.f32 %v889_v0, %v840_v1 }
 0x201   : > { %905 = vst.msk [vmem:[#allocation7 + $0x38] sm:$0xff] %vm841_vm10, %v897_v2  ;;  %v856_v2 = vld [vmem:[#allocation6 + $0x30] sm:$0xff] }
 0x202   : > { %v864_v16 = vmul.f32 %v1845_v59, %v856_v2 }
 0x21a   : > { %1370 = vset.pattern.permute.xlu0 %v1469_v39 }
 0x21b   : > { %921 = vperm.xlu0 %1370, %v1853_v6   ;;  %v857_v6 = vld [vmem:[#allocation6 + $0x38] sm:$0xff] }
 0x255   : > { %v559_v8 = vpop.trf.xlu0 }
 0x256   : > { %1284 = vmatmul.mubr.msk.f32.vlgmr.msra.gmra.mrb[2].mxu0 %vm575_vm13, %v559_v8 }
 0x263   : > { %v917_v22 = vpop.permute.xlu1 %916 }
 0x267   : > { %v927_v27 = vpop.permute.xlu1 %926 }
 0x26b   : > { %v932_v28 = vpop.permute.xlu1 %931 }
 0x26f   : > { %v1891_v30 = vpop.permute.xlu1 %936 }
 0x273   : > { %v1893_v32 = vpop.permute.xlu1 %941 }
 0x277   : > { %v1895_v34 = vpop.permute.xlu1 %946 }
 0x329   : > { %v645_v53 = vpop.f32.mrb[2].mxu0 }
 0x32a   : > { %v649_v60 = vsub.f32 %v1659_v58, %v645_v53  ;;  %v1285_v13 = vpop.f32.mrb[3].mxu0  ;;  %v922_v53 = vpop.permute.xlu0 %921 }
 0x32c   : > { %v650_v39 = vmul.f32 1.442695, %v649_v60  ;;  %v906_v60 = vld [vmem:[%s2035_s6] sm:$0xff] }
 0x32d   : > { %v954_v13 = vmul.f32 %v917_v22, %v906_v60 }
 0x32e   : > { %1385 = vpow2.f32 %v650_v39  ;;  %v909_v39 = vld [vmem:[%s2035_s6 + $0x18] sm:$0xff] }
 0x338   : > { %v1386_v15 = vpop.eup %1385 }
 0x339   : > { %v655_v17 = vrot.slane %v1386_v15, %v477_v51 }
 0x33b   : > { %v656_v19 = vmul.f32 %v1726_v23, %v655_v17  ;;  %v657_v9 = vmul.f32 %v1735_v29, %v655_v17  ;;  %v658_v24 = vmul.f32 %v1742_v31, %v655_v17  ;;  %v659_v25 = vmul.f32 %v1749_v33, %v655_v17 }
 0x33c   : > { %v660_v51 = vmul.f32 %v1756_v35, %v655_v17  ;;  %v661_v58 = vmul.f32 %v1763_v37, %v655_v17  ;;  %v662_v29 = vmul.f32 %v1771_v40, %v655_v17  ;;  %v663_v31 = vmul.f32 %v1778_v43, %v655_v17  ;;  %v908_v17 = vld [vmem:[%s2035_s6 + $0x10] sm:$0xff] }
 0x33d   : > { %1294 = vmatprep.mubr.msk.f32.mxu1 %vm239_vm3, %v656_v19  ;;  %v664_v11 = vsel %vm239_vm3, %v656_v19, 0.0  ;;  %v667_v41 = vsel %vm239_vm3, %v657_v9, 0.0  ;;  %v670_v23 = vsel %vm239_vm3, %v658_v24, 0.0  ;;  %v673_v33 = vsel %vm239_vm3, %v659_v25, 0.0 }
 0x33e   : > { %1295 = vmatmul.mubr.msk.f32.vlgmr.msra.gmra.mrb[2].mxu1 %vm239_vm3, %v657_v9  ;;  %665 = vadd.xlane.f32.xlu1 %v664_v11  ;;  %v676_v35 = vsel %vm239_vm3, %v660_v51, 0.0  ;;  %v679_v37 = vsel %vm239_vm3, %v661_v58, 0.0  ;;  %v682_v40 = vsel %vm239_vm3, %v662_v29, 0.0  ;;  %v685_v20 = vsel %vm239_vm3, %v663_v31, 0.0 }
 0x33f   : > { %1297 = vmatprep.mubr.msk.f32.mxu1 %vm239_vm3, %v658_v24  ;;  %v541_v43 = vmul.f32 1.442695, %v526_v18  ;;  %v852_v18 = vld [vmem:[#allocation6 + $0x10] sm:$0xff]  ;;  %v957_v24 = vmul.f32 %v932_v28, %v909_v39 }
 0x340   : > { %v860_v48 = vmul.f32 %v1828_v36, %v852_v18  ;;  %v863_v36 = vmul.f32 %v1841_v7, %v855_v63  ;;  %v907_v7 = vld [vmem:[%s2035_s6 + $0x8] sm:$0xff] }
 0x341   : > { %1387 = vpow2.f32 %v541_v43  ;;  %v955_v59 = vmul.f32 %v922_v53, %v907_v7  ;;  %v912_v43 = vld [vmem:[%s2035_s6 + $0x30] sm:$0xff] }
 0x342   : > { %1298 = vmatmul.mubr.msk.f32.gmra.mrb[4].mxu1 %vm239_vm3, %v659_v25  ;;  %668 = vadd.xlane.f32.xlu1 %v667_v41  ;;  %v956_v25 = vmul.f32 %v927_v27, %v908_v17  ;;  %v911_v41 = vld [vmem:[%s2035_s6 + $0x28] sm:$0xff] }
 0x343   : > { %1300 = vmatprep.mubr.msk.f32.mxu1 %vm239_vm3, %v660_v51 }
 0x346   : > { %1301 = vmatmul.mubr.msk.f32.gmra.mrb[6].mxu1 %vm239_vm3, %v661_v58  ;;  %671 = vadd.xlane.f32.xlu1 %v670_v23  ;;  %v910_v58 = vld [vmem:[%s2035_s6 + $0x20] sm:$0xff] }
 0x347   : > { %1303 = vmatprep.mubr.msk.f32.mxu1 %vm239_vm3, %v662_v29 }
 0x34a   : > { %1304 = vmatmul.mubr.msk.f32.gmra.mrb[8].mxu1 %vm239_vm3, %v663_v31  ;;  %674 = vadd.xlane.f32.xlu1 %v673_v33  ;;  %v959_v33 = vmul.f32 %v1893_v32, %v911_v41 }
 0x34b   : > { %v1388_v21 = vpop.eup %1387 }
 0x34c   : > { %v865_v49 = vmul.f32 %v1388_v21, %v857_v6  ;;  %v988_v6 = vld [vmem:[#allocation7 + $0x30] sm:$0xff] (!%p1211_p6) }
 0x34d   : > { %vm1020_vm6 = vcmp.gt.f32.partialorder (!%p1211_p6), %v988_v6, 0.0 }
 0x34e   : > { %677 = vadd.xlane.f32.xlu1 %v676_v35  ;;  %v958_v35 = vmul.f32 %v1891_v30, %v910_v58  ;;  %v960_v30 = vmul.f32 %v1895_v34, %v912_v43  ;;  %v984_v34 = vld [vmem:[#allocation7 + $0x10] sm:$0xff] (!%p1211_p6) }
 0x34f   : > { %vm1016_vm1 = vcmp.gt.f32.partialorder (!%p1211_p6), %v984_v34, 0.0 }
 0x352   : > { %680 = vadd.xlane.f32.xlu1 %v679_v37  ;;  %v913_v37 = vld [vmem:[%s2035_s6 + $0x38] sm:$0xff] }
 0x356   : > { %683 = vadd.xlane.f32.xlu1 %v682_v40 }
 0x35a   : > { %686 = vadd.xlane.f32.xlu1 %v685_v20 }
 0x36b   : > { %951 = vperm.xlu1 %1369, %v1388_v21  }
 0x3cb   : > { %v666_v44 = vpop.xlane.xlu1 %665 }
 0x3cc   : > { %v866_v46 = vadd.f32 %v858_v42, %v666_v44 }
 0x3ce   : > { %874 = vst.msk [vmem:[#allocation6] sm:$0xff] %vm841_vm10, %v866_v46  ;;  %v982_v46 = vld [vmem:[#allocation7] sm:$0xff] (!%p1211_p6) }
 0x3cf   : > { %v669_v14 = vpop.xlane.xlu1 %668  ;;  %vm1014_vm15 = vcmp.gt.f32.partialorder (!%p1211_p6), %v982_v46, 0.0 }
 0x3d0   : > { %v867_v47 = vadd.f32 %v859_v5, %v669_v14  ;;  %v1471_v5 = vmov (!%p1211_p6), 0  }
 0x3d1   : > { %1390 = vset.pattern.permute.xlu1 (!%p1211_p6), %v1471_v5  ;;  %1389 = vset.pattern.permute.xlu0 (!%p1211_p6), %v1471_v5 }
 0x3d2   : > { %875 = vst.msk [vmem:[#allocation6 + $0x8] sm:$0xff] %vm841_vm10, %v867_v47  ;;  %v985_v47 = vld [vmem:[#allocation7 + $0x18] sm:$0xff] (!%p1211_p6) }
 0x3d3   : > { %v672_v50 = vpop.xlane.xlu1 %671  ;;  %vm1017_vm0 = vcmp.gt.f32.partialorder (!%p1211_p6), %v985_v47, 0.0 }
 0x3d4   : > { %v868_v54 = vadd.f32 %v860_v48, %v672_v50  ;;  %v1089_v39 = vsel (!%p1211_p6), %vm1017_vm0, 1, %v1471_v5 }
 0x3d5   : > { %v990_v18 = vld [vmem:[#allocation6] sm:$0xff] (!%p1211_p6) }
 0x3d6   : > { %876 = vst.msk [vmem:[#allocation6 + $0x10] sm:$0xff] %vm841_vm10, %v868_v54  ;;  %v998_v50 = vmul.f32 (!%p1211_p6), %v990_v18, %v982_v46  ;;  %v983_v54 = vld [vmem:[#allocation7 + $0x8] sm:$0xff] (!%p1211_p6) }
 0x3d7   : > { %v675_v55 = vpop.xlane.xlu1 %674  ;;  %vm1015_vm14 = vcmp.gt.f32.partialorder (!%p1211_p6), %v983_v54, 0.0 }
 0x3d8   : > { %v869_v57 = vadd.f32 %v861_v26, %v675_v55  ;;  %v987_v55 = vld [vmem:[#allocation7 + $0x28] sm:$0xff] (!%p1211_p6) }
 0x3d9   : > { %v991_v26 = vld [vmem:[#allocation6 + $0x8] sm:$0xff] (!%p1211_p6)  ;;  %vm1019_vm2 = vcmp.gt.f32.partialorder (!%p1211_p6), %v987_v55, 0.0 }
 0x3da   : > { %877 = vst.msk [vmem:[#allocation6 + $0x18] sm:$0xff] %vm841_vm10, %v869_v57  ;;  %v999_v57 = vmul.f32 (!%p1211_p6), %v991_v26, %v983_v54  ;;  %v1091_v17 = vsel (!%p1211_p6), %vm1019_vm2, 1, %v1471_v5 }
 0x3db   : > { %v678_v62 = vpop.xlane.xlu1 %677 }
 0x3dc   : > { %v870_v0 = vadd.f32 %v862_v61, %v678_v62  ;;  %v986_v62 = vld [vmem:[#allocation7 + $0x20] sm:$0xff] (!%p1211_p6)  ;;  %v1007_v2 = vmax.f32 (!%p1211_p6), %v999_v57, 1e-30 }
 0x3dd   : > { %v992_v45 = vld [vmem:[#allocation6 + $0x10] sm:$0xff] (!%p1211_p6)  ;;  %vm1018_vm4 = vcmp.gt.f32.partialorder (!%p1211_p6), %v986_v62, 0.0 }
 0x3de   : > { %878 = vst.msk [vmem:[#allocation6 + $0x20] sm:$0xff] %vm841_vm10, %v870_v0  ;;  %v1000_v14 = vmul.f32 (!%p1211_p6), %v992_v45, %v984_v34  ;;  %v1006_v0 = vmax.f32 (!%p1211_p6), %v998_v50, 1e-30 }
 0x3df   : > { %v681_v1 = vpop.xlane.xlu1 %680 }
 0x3e0   : > { %v871_v3 = vadd.f32 %v863_v36, %v681_v1  ;;  %v1008_v56 = vmax.f32 (!%p1211_p6), %v1000_v14, 1e-30  ;;  %1032 = vperm.xlu0 (!%p1211_p6), %1389, %v1006_v0  }
 0x3e1   : > { %v993_v48 = vld [vmem:[#allocation6 + $0x18] sm:$0xff] (!%p1211_p6) }
 0x3e2   : > { %879 = vst.msk [vmem:[#allocation6 + $0x28] sm:$0xff] %vm841_vm10, %v871_v3  ;;  %v1001_v52 = vmul.f32 (!%p1211_p6), %v993_v48, %v985_v47  ;;  %1042 = vperm.xlu1 (!%p1211_p6), %1390, %v1008_v56  }
 0x3e3   : > { %v684_v4 = vpop.xlane.xlu1 %683 }
 0x3e4   : > { %v872_v8 = vadd.f32 %v864_v16, %v684_v4  ;;  %v1009_v36 = vmax.f32 (!%p1211_p6), %v1001_v52, 1e-30  ;;  %v989_v16 = vld [vmem:[#allocation7 + $0x38] sm:$0xff] (!%p1211_p6)  ;;  %1037 = vperm.xlu0 (!%p1211_p6), %1389, %v1007_v2  }
 0x3e5   : > { %v994_v63 = vld [vmem:[#allocation6 + $0x20] sm:$0xff] (!%p1211_p6)  ;;  %vm1021_vm5 = vcmp.gt.f32.partialorder (!%p1211_p6), %v989_v16, 0.0 }
 0x3e6   : > { %880 = vst.msk [vmem:[#allocation6 + $0x30] sm:$0xff] %vm841_vm10, %v872_v8  ;;  %v1002_v3 = vmul.f32 (!%p1211_p6), %v994_v63, %v986_v62  ;;  %1047 = vperm.xlu1 (!%p1211_p6), %1390, %v1009_v36  }
 0x3e7   : > { %v687_v10 = vpop.xlane.xlu1 %686 }
 0x3e8   : > { %v873_v12 = vadd.f32 %v865_v49, %v687_v10 }
 0x3e9   : > { %v995_v61 = vld [vmem:[#allocation6 + $0x28] sm:$0xff] (!%p1211_p6) }
 0x3ea   : > { %881 = vst.msk [vmem:[#allocation6 + $0x38] sm:$0xff] %vm841_vm10, %v873_v12  ;;  %v1003_v1 = vmul.f32 (!%p1211_p6), %v995_v61, %v987_v55  ;;  %v1010_v12 = vmax.f32 (!%p1211_p6), %v1002_v3, 1e-30 }
 0x3eb   : > { %v952_v40 = vpop.permute.xlu1 %951 }
 0x3ec   : > { %v961_v28 = vmul.f32 %v952_v40, %v913_v37  ;;  %v1011_v49 = vmax.f32 (!%p1211_p6), %v1003_v1, 1e-30  ;;  %1052 = vperm.xlu0 (!%p1211_p6), %1389, %v1010_v12  }
 0x3ed   : > { %v996_v8 = vld [vmem:[#allocation6 + $0x30] sm:$0xff] (!%p1211_p6) }
 0x3ee   : > { %v1004_v7 = vmul.f32 (!%p1211_p6), %v996_v8, %v988_v6  ;;  %1057 = vperm.xlu1 (!%p1211_p6), %1390, %v1011_v49  }
 0x3f0   : > { %v1012_v60 = vmax.f32 (!%p1211_p6), %v1004_v7, 1e-30 }
 0x3f1   : > { %v997_v4 = vld [vmem:[#allocation6 + $0x38] sm:$0xff] (!%p1211_p6) }
 0x3f2   : > { %v1005_v10 = vmul.f32 (!%p1211_p6), %v997_v4, %v989_v16  ;;  %1062 = vperm.xlu0 (!%p1211_p6), %1389, %v1012_v60  }
 0x3f4   : > { %v1013_v53 = vmax.f32 (!%p1211_p6), %v1005_v10, 1e-30 }
 0x3f6   : > { %1067 = vperm.xlu1 (!%p1211_p6), %1390, %v1013_v53  }
 0x411   : > { %v1296_v15 = vpop.f32.mrb[2].mxu1 }
 0x412   : > { %v963_v19 = vadd.f32 %v1296_v15, %v955_v59  ;;  %v778_v9 = vpop.f32.mrb[3].mxu1  ;;  %v1087_v59 = vsel (!%p1211_p6), %vm1015_vm14, 1, %v1471_v5  ;;  %v1088_v15 = vsel (!%p1211_p6), %vm1016_vm1, 1, %v1471_v5 }
 0x413   : > { %v962_v11 = vadd.f32 %v954_v13, %v778_v9  ;;  %v1086_v13 = vsel (!%p1211_p6), %vm1014_vm15, 1, %v1471_v5  ;;  %1098 = vperm.xlu1 (!%p1211_p6), %1390, %v1087_v59   ;;  %v1093_v9 = vsel (!%p1211_p6), %vm1021_vm5, 1, %v1471_v5 }
 0x414   : > { %971 = vst.msk [vmem:[%s2035_s6 + $0x8] sm:$0xff] %vm239_vm3, %v963_v19  ;;  %1095 = vperm.xlu0 (!%p1211_p6), %1389, %v1086_v13   ;;  %v1090_v19 = vsel (!%p1211_p6), %vm1018_vm4, 1, %v1471_v5 }
 0x415   : > { %970 = vst.msk [vmem:[%s2035_s6] sm:$0xff] %vm239_vm3, %v962_v11  ;;  %v1299_v51 = vpop.f32.mrb[4].mxu1  ;;  %v1092_v11 = vsel (!%p1211_p6), %vm1020_vm6, 1, %v1471_v5 }
 0x416   : > { %v965_v23 = vadd.f32 %v1299_v51, %v957_v24  ;;  %v788_v29 = vpop.f32.mrb[5].mxu1 }
 0x417   : > { %v964_v31 = vadd.f32 %v956_v25, %v788_v29  ;;  %1104 = vperm.xlu1 (!%p1211_p6), %1390, %v1089_v39  }
 0x418   : > { %973 = vst.msk [vmem:[%s2035_s6 + $0x18] sm:$0xff] %vm239_vm3, %v965_v23  ;;  %1101 = vperm.xlu0 (!%p1211_p6), %1389, %v1088_v15  }
 0x419   : > { %972 = vst.msk [vmem:[%s2035_s6 + $0x10] sm:$0xff] %vm239_vm3, %v964_v31  ;;  %v1302_v20 = vpop.f32.mrb[6].mxu1 }
 0x41a   : > { %v967_v21 = vadd.f32 %v1302_v20, %v959_v33  ;;  %v798_v22 = vpop.f32.mrb[7].mxu1 }
 0x41b   : > { %v966_v27 = vadd.f32 %v958_v35, %v798_v22  ;;  %981 = sbr.rel (%p1211_p6) target bundleno = 1187 (0x4a3), region = 47  ;;  %1110 = vperm.xlu1 (!%p1211_p6), %1390, %v1091_v17   ;;  %v1023_v35 = vld [vmem:[%s2035_s6 + $0x8] sm:$0xff] (!%p1211_p6) }
 0x41c   : > { %975 = vst.msk [vmem:[%s2035_s6 + $0x28] sm:$0xff] %vm239_vm3, %v967_v21  ;;  %1107 = vperm.xlu0 (!%p1211_p6), %1389, %v1090_v19   ;;  %v1022_v37 = vld [vmem:[%s2035_s6] sm:$0xff] (!%p1211_p6) }
 0x41d   : > { %974 = vst.msk [vmem:[%s2035_s6 + $0x20] sm:$0xff] %vm239_vm3, %v966_v27  ;;  %v1305_v32 = vpop.f32.mrb[8].mxu1 }
 0x41e   : > { %v969_v38 = vadd.f32 %v1305_v32, %v961_v28  ;;  %v808_v42 = vpop.f32.mrb[9].mxu1 }
 0x41f   : > { %v968_v44 = vadd.f32 %v960_v30, %v808_v42  ;;  %1116 = vperm.xlu1 (!%p1211_p6), %1390, %v1093_v9   ;;  %v1025_v28 = vld [vmem:[%s2035_s6 + $0x18] sm:$0xff] (!%p1211_p6) }
 0x420   : > { %977 = vst.msk [vmem:[%s2035_s6 + $0x38] sm:$0xff] %vm239_vm3, %v969_v38  ;;  %1113 = vperm.xlu0 (!%p1211_p6), %1389, %v1092_v11   ;;  %v1024_v32 = vld [vmem:[%s2035_s6 + $0x10] sm:$0xff] (!%p1211_p6) }
 0x421   : > { %976 = vst.msk [vmem:[%s2035_s6 + $0x30] sm:$0xff] %vm239_vm3, %v968_v44 }
 0x423   : > { %v1027_v14 = vld [vmem:[%s2035_s6 + $0x28] sm:$0xff] }
 0x424   : > { %v1026_v48 = vld [vmem:[%s2035_s6 + $0x20] sm:$0xff] }
 0x427   : > { %v1029_v57 = vld [vmem:[%s2035_s6 + $0x38] sm:$0xff] }
 0x428   : > { %v1028_v63 = vld [vmem:[%s2035_s6 + $0x30] sm:$0xff] }
 0x45f   : > { %v1033_v25 = vpop.permute.xlu0 %1032 }
 0x460   : > { %1391 = vrcp.f32 %v1033_v25 }
 0x461   : > { %v1043_v24 = vpop.permute.xlu1 %1042 }
 0x463   : > { %v1038_v51 = vpop.permute.xlu0 %1037 }
 0x464   : > { %1393 = vrcp.f32 %v1038_v51 }
 0x465   : > { %v1048_v41 = vpop.permute.xlu1 %1047 }
 0x466   : > { %1395 = vrcp.f32 %v1048_v41 }
 0x467   : > { %1397 = vrcp.f32 %v1043_v24 }
 0x46a   : > { %v1392_v33 = vpop.eup %1391 }
 0x46b   : > { %v1053_v23 = vpop.permute.xlu0 %1052  ;;  %v1071_v22 = vmul.f32 %v1392_v33, %v1022_v37 }
 0x46d   : > { %v1058_v58 = vpop.permute.xlu1 %1057 }
 0x46e   : > { %1399 = vrcp.f32 %v1058_v58  ;;  %v1394_v40 = vpop.eup %1393 }
 0x46f   : > { %1401 = vrcp.f32 %v1053_v23  ;;  %v1073_v21 = vmul.f32 %v1394_v40, %v1023_v35 }
 0x470   : > { %v1396_v43 = vpop.eup %1395 }
 0x471   : > { %v1063_v31 = vpop.permute.xlu0 %1062  ;;  %v1398_v30 = vpop.eup %1397  ;;  %v1077_v44 = vmul.f32 %v1396_v43, %v1025_v28 }
 0x472   : > { %v1075_v46 = vmul.f32 %v1398_v30, %v1024_v32 }
 0x475   : > { %v1068_v29 = vpop.permute.xlu1 %1067 }
 0x476   : > { %1403 = vrcp.f32 %v1068_v29 }
 0x477   : > { %1405 = vrcp.f32 %v1063_v31 }
 0x478   : > { %v1400_v45 = vpop.eup %1399 }
 0x479   : > { %v1402_v18 = vpop.eup %1401  ;;  %v1081_v52 = vmul.f32 %v1400_v45, %v1027_v14 }
 0x47a   : > { %v1079_v55 = vmul.f32 %v1402_v18, %v1026_v48 }
 0x480   : > { %v1404_v26 = vpop.eup %1403 }
 0x481   : > { %v1406_v61 = vpop.eup %1405  ;;  %v1085_v36 = vmul.f32 %v1404_v26, %v1029_v57 }
 0x482   : > { %v1083_v2 = vmul.f32 %v1406_v61, %v1028_v63 }
 0x492   : > { %v1099_v20 = vpop.permute.xlu1 %1098 }
 0x493   : > { %vm1119_vm8 = vcmp.eq.s32.totalorder %v1099_v20, 1  ;;  %v1096_v27 = vpop.permute.xlu0 %1095 }
 0x494   : > { %vm1118_vm7 = vcmp.eq.s32.totalorder %v1096_v27, 1  ;;  %v1127_v38 = vsel %vm1119_vm8, %v1073_v21, 0.0 }
 0x495   : > { %v1126_v42 = vsel %vm1118_vm7, %v1071_v22, 0.0  ;;  %1135 = vst.msk [vmem:[%s2035_s6 + $0x8] sm:$0xff] %vm239_vm3, %v1127_v38 }
 0x496   : > { %1134 = vst.msk [vmem:[%s2035_s6] sm:$0xff] %vm239_vm3, %v1126_v42  ;;  %v1105_v34 = vpop.permute.xlu1 %1104 }
 0x497   : > { %vm1121_vm9 = vcmp.eq.s32.totalorder %v1105_v34, 1  ;;  %v1102_v5 = vpop.permute.xlu0 %1101 }
 0x498   : > { %v1129_v47 = vsel %vm1121_vm9, %v1077_v44, 0.0  ;;  %vm1120_vm11 = vcmp.eq.s32.totalorder %v1102_v5, 1 }
 0x499   : > { %1137 = vst.msk [vmem:[%s2035_s6 + $0x18] sm:$0xff] %vm239_vm3, %v1129_v47  ;;  %v1128_v50 = vsel %vm1120_vm11, %v1075_v46, 0.0 }
 0x49a   : > { %1136 = vst.msk [vmem:[%s2035_s6 + $0x10] sm:$0xff] %vm239_vm3, %v1128_v50  ;;  %v1111_v54 = vpop.permute.xlu1 %1110 }
 0x49b   : > { %vm1123_vm12 = vcmp.eq.s32.totalorder %v1111_v54, 1  ;;  %v1108_v56 = vpop.permute.xlu0 %1107 }
 0x49c   : > { %v1131_v62 = vsel %vm1123_vm12, %v1081_v52, 0.0  ;;  %vm1122_vm10 = vcmp.eq.s32.totalorder %v1108_v56, 1 }
 0x49d   : > { %1139 = vst.msk [vmem:[%s2035_s6 + $0x28] sm:$0xff] %vm239_vm3, %v1131_v62  ;;  %v1130_v0 = vsel %vm1122_vm10, %v1079_v55, 0.0 }
 0x49e   : > { %1138 = vst.msk [vmem:[%s2035_s6 + $0x20] sm:$0xff] %vm239_vm3, %v1130_v0  ;;  %v1117_v1 = vpop.permute.xlu1 %1116 }
 0x49f   : > { %vm1125_vm13 = vcmp.eq.s32.totalorder %v1117_v1, 1  ;;  %v1114_v3 = vpop.permute.xlu0 %1113 }
 0x4a0   : > { %v1133_v16 = vsel %vm1125_vm13, %v1085_v36, 0.0  ;;  %vm1124_vm14 = vcmp.eq.s32.totalorder %v1114_v3, 1 }
 0x4a1   : > { %1141 = vst.msk [vmem:[%s2035_s6 + $0x38] sm:$0xff] %vm239_vm3, %v1133_v16  ;;  %v1132_v4 = vsel %vm1124_vm14, %v1083_v2, 0.0 }
 0x4a2   : > { %1140 = vst.msk [vmem:[%s2035_s6 + $0x30] sm:$0xff] %vm239_vm3, %v1132_v4 }
 0x4a3 PF: > { %s30_s10 = sadd.s32 1, %s1455_s10  }
 0x4a4   : > { %p27_p7 = scmp.ge.s32.totalorder %s30_s10, 6  }
 0x4a6   :  { %29 = sbr.rel (!%p27_p7) target bundleno = 36 (0x24), region = 88 }

</bundles_post_ra>
